<compile_context>
chip_gen: v7x
topology: tpu7x:2x2x1
jax: 0.10.0
libtpu: 0.0.40
codegen_flags: <defaults>
</compile_context>

<pallas_src>
import jax
import jax.numpy as jnp
from jax.experimental import pallas as pl
from jax.experimental.pallas import tpu as pltpu


def _dma_copy_kernel(x_hbm, o_hbm, sem):
    # Single HBM->HBM DMA of the whole (B, C) array; no VMEM staging.
    cp = pltpu.make_async_copy(x_hbm, o_hbm, sem)
    cp.start()
    cp.wait()


def flatten(x: jax.Array) -> jax.Array:
    """Tensor BCHW (B, C, 1, 1) -> (B, C), matching Flatten.forward."""
    assert x.ndim == 4, f"expected 4-D NCHW input, got {x.shape}"
    B, C, H, W = x.shape
    assert H == 1 and W == 1, (
        f"expected spatial dimension to be 1 x 1 but found {H} x {W}"
    )

    # Free metadata reshape: drop the trailing size-1 dims. The (B, C) view is
    # contiguous, so the kernel's single DMA is one linear HBM->HBM transfer.
    x2 = jnp.reshape(x, (B, C))

    return pl.pallas_call(
        _dma_copy_kernel,
        out_shape=jax.ShapeDtypeStruct((B, C), x.dtype),
        in_specs=[pl.BlockSpec(memory_space=pl.ANY)],
        out_specs=pl.BlockSpec(memory_space=pl.ANY),
        scratch_shapes=[pltpu.SemaphoreType.DMA(())],
    )(x2)


if __name__ == "__main__":
    key = jax.random.PRNGKey(0)

    # Primary test: the module's expected small shape (B, C, 1, 1).
    B, C = 2, 4
    x = jax.random.normal(key, (B, C, 1, 1), dtype=jnp.float32)
    y = flatten(x)
    jax.block_until_ready(y)
    ref = jnp.squeeze(x, axis=(2, 3))
    assert y.shape == (B, C), y.shape
    assert y.dtype == x.dtype, y.dtype
    assert jnp.array_equal(y, ref), "mismatch vs. reference squeeze (small case)"

    # Secondary test: a larger (still small) shape + non-f32 dtype to exercise
    # the same single-DMA path with a non-trivial, non-lane-aligned C.
    B2, C2 = 64, 200
    x2 = jax.random.normal(jax.random.PRNGKey(1), (B2, C2, 1, 1)).astype(jnp.bfloat16)
    y2 = flatten(x2)
    jax.block_until_ready(y2)
    ref2 = jnp.squeeze(x2, axis=(2, 3))
    assert y2.shape == (B2, C2), y2.shape
    assert y2.dtype == x2.dtype, y2.dtype
    assert jnp.array_equal(y2, ref2), "mismatch vs. reference squeeze (bf16 case)"

    print("KERNEL_OK")
</pallas_src>

<mosaic_0001>
module attributes {stable_mosaic.version = 11 : i64} {
  func.func @_dma_copy_kernel(%arg0: memref<2x4xf32, #tpu.memory_space<any>>, %arg1: memref<2x4xf32, #tpu.memory_space<any>>, %arg2: memref<!tpu.dma_semaphore, #tpu.memory_space<semaphore_mem>>) attributes {dimension_semantics = [], scalar_prefetch = 0 : i64, scratch_operands = 1 : i64, tpu.core_type = #tpu.core_type<tc>} {
    tpu.enqueue_dma source(%arg0 : memref<2x4xf32, #tpu.memory_space<any>>) target(%arg1 : memref<2x4xf32, #tpu.memory_space<any>>) target_semaphore(%arg2 : memref<!tpu.dma_semaphore, #tpu.memory_space<semaphore_mem>>)
    tpu.wait_dma2 semaphore(%arg2 : memref<!tpu.dma_semaphore, #tpu.memory_space<semaphore_mem>>) src(%arg0 : memref<2x4xf32, #tpu.memory_space<any>>) dst(%arg1 : memref<2x4xf32, #tpu.memory_space<any>>)
    return
  }
}

</mosaic_0001>

<bundles_post_ra>
// kernel: tpu_custom_call.1
= control target key start
LH: loop header
LB: loop body
LE: loop exit
PB: predicated region body
PF: predicated region fallthrough
CT: control target
= control target key end

     0   :  { %s34_s6 = smov [#allocation2]   ;;  %s35_s7 = smov [#allocation3]   ;;  %s53_s0 = inlined_call_operand.hbm [shape: f32[2,4], index: 0, kind: input, shape index: {}]   ;;  %s54_s1 = inlined_call_operand.hbm [shape: f32[2,4], index: 1, kind: output, shape index: {}]  }
   0x1   :  { %s36_s8 = smov 0  }
   0x2   :  { %18 = dma.general %s53_s0, 32, %s54_s1, %s34_s6, %s35_s7, [#allocation4], %s36_s8, 0  }
   0x3   :  { %32 = dma.done.wait [#allocation2], 32 }
   0x4   :  { %33 = vsyncadd [#allocation2], 4294967264 }
   0x5   :  { %22 = vsyncmov [#allocation2] }
   0x8   :  { %s23_s13 = vpop.sfrf %22 }
   0x9   :  { %p28_p0 = scmp.ne.s32.totalorder %s23_s13, 0 }
   0xb   :  { %27 = shalt.err (%p28_p0)  }

</bundles_post_ra>
